<compile_context>
chip_gen: v7x
topology: tpu7x:2x2x1
jax: 0.10.0
libtpu: 0.0.40
codegen_flags: <defaults>
</compile_context>

<pallas_src>
import jax
import jax.numpy as jnp
from jax import lax
from jax.experimental import pallas as pl
from jax.experimental.pallas import tpu as pltpu


def _round_up(x, m):
    return (x + m - 1) // m * m


def _im2col_matmul_kernel(p_ref, w_ref, b_ref, o_ref):
    # p_ref: (Mb, KKC)   im2col patches for this row block (f32 or bf16)
    # w_ref: (KKC, Cout) matmul-ready weight
    # b_ref: (1, Cout)   f32 effective bias (t-channel folded in when padding=0)
    # o_ref: (Mb, Cout)  output block at its true channel width
    acc = jnp.dot(p_ref[...], w_ref[...], preferred_element_type=jnp.float32)
    o_ref[...] = (acc + b_ref[...]).astype(o_ref.dtype)


def concat_conv2d(t, x, weight, bias, *, padding=0, grid_m=1, compute_dtype=None):
    """ConcatConv2d forward.

    t: scalar, x: [N, Cin, H, W], weight: [Cout, Cin+1, K, K], bias: [Cout].
    Returns [N, Cout, Hout, Wout] in NCHW (matching the torch module).

    grid_m=1 is best on v5e/v6e (single TensorCore); grid_m=2 splits the row
    axis across the two TensorCores of a v7x chip via CORE_PARALLEL.
    compute_dtype=jnp.bfloat16 halves HBM read bytes (f32 accumulation kept).
    """
    N, Cin, H, W = x.shape
    Cout, Cin1, K, _ = weight.shape
    assert Cin1 == Cin + 1
    assert padding >= 0
    cdt = compute_dtype if compute_dtype is not None else x.dtype

    x_nhwc = jnp.transpose(x, (0, 2, 3, 1))                          # (N,H,W,Cin)

    if padding == 0:
        # Fold the constant t-channel into the bias: exact for VALID conv,
        # stride 1.  The kernel then contracts over Cin only.
        bias_eff = (bias.astype(jnp.float32)
                    + jnp.float32(t)
                    * jnp.sum(weight[:, 0].astype(jnp.float32), axis=(-2, -1)))
        feat = x_nhwc                                                # (N,H,W,Cin)
        w_sel = weight[:, 1:]                                        # drop t chan
        Cf = Cin
    else:
        # Explicit t channel: value t in the interior, 0 in the zero-padded
        # border — exactly what Conv2d(padding=p) sees after torch.cat.
        bias_eff = bias.astype(jnp.float32)
        tt = jnp.full((N, H, W, 1), t, x.dtype)
        feat = jnp.concatenate([tt, x_nhwc], axis=-1)                # (N,H,W,Cin+1)
        feat = jnp.pad(feat, ((0, 0), (padding, padding),
                              (padding, padding), (0, 0)))
        w_sel = weight
        Cf = Cin + 1

    Hp, Wp = feat.shape[1], feat.shape[2]
    Hout, Wout = Hp - K + 1, Wp - K + 1
    KKC = K * K * Cf
    M = N * Hout * Wout

    # --- im2col, pre-packed in the wrapper: (M, K*K*Cf), patch order (ky,kx,cf).
    taps = [feat[:, ky:ky + Hout, kx:kx + Wout, :]
            for ky in range(K) for kx in range(K)]
    patches = jnp.stack(taps, axis=3).reshape(M, KKC).astype(cdt)

    # --- matmul-ready weight in the same (ky, kx, cf) order.
    w2d = jnp.transpose(w_sel, (2, 3, 1, 0)).reshape(KKC, Cout).astype(cdt)
    b2d = bias_eff.reshape(1, Cout)                                   # f32

    # --- row padding only if the grid split requires it (M=N*Hout*Wout is
    #     already a multiple of 8 for the shapes used here, so grid_m=1 pads
    #     nothing and copies nothing).
    Mpad = _round_up(M, 8 * grid_m)
    if Mpad != M:
        patches = jnp.pad(patches, ((0, Mpad - M), (0, 0)))
    Mb = Mpad // grid_m

    isz = jnp.dtype(cdt).itemsize
    osz = jnp.dtype(x.dtype).itemsize
    # Per-step VMEM footprint (double-buffered inputs/outputs + resident weight),
    # with headroom; clamp to 32 MiB so it is safe on every generation (v7x has
    # 64 MiB physical / ~32 MiB scoped VMEM; raise on v5e/v6e for bigger M).
    block_bytes = 2 * (Mb * KKC * isz + Mb * Cout * osz) \
        + 2 * (KKC * Cout * isz + Cout * 4)
    vmem_limit = int(min(max(2 * block_bytes, 4 << 20), 32 << 20))

    if grid_m > 1:
        dim_sem = (pltpu.CORE_PARALLEL,)      # actually land one block per TC (v7x)
    else:
        dim_sem = ("arbitrary",)

    cost = pl.CostEstimate(
        flops=2 * Mpad * KKC * Cout,
        bytes_accessed=Mpad * KKC * isz + KKC * Cout * isz + Cout * 4
        + Mpad * Cout * osz,
        transcendentals=0,
    )

    out_flat = pl.pallas_call(
        _im2col_matmul_kernel,
        out_shape=jax.ShapeDtypeStruct((Mpad, Cout), x.dtype),
        grid=(grid_m,),
        in_specs=[
            pl.BlockSpec((Mb, KKC), lambda m: (m, 0)),
            pl.BlockSpec((KKC, Cout), lambda m: (0, 0)),
            pl.BlockSpec((1, Cout), lambda m: (0, 0)),
        ],
        out_specs=pl.BlockSpec((Mb, Cout), lambda m: (m, 0)),
        compiler_params=pltpu.CompilerParams(
            dimension_semantics=dim_sem,
            vmem_limit_bytes=vmem_limit),
        cost_estimate=cost,
    )(patches, w2d, b2d)

    if Mpad != M:
        out_flat = out_flat[:M]
    out = out_flat.reshape(N, Hout, Wout, Cout)
    return jnp.transpose(out, (0, 3, 1, 2))                           # NCHW


def _reference(t, x, weight, bias, *, padding=0):
    # Pure-JAX reference: lax conv on the explicitly concatenated input.
    N, Cin, H, W = x.shape
    tt = jnp.ones((N, 1, H, W), x.dtype) * t
    ttx = jnp.concatenate([tt, x], axis=1)
    out = lax.conv_general_dilated(
        ttx, weight, window_strides=(1, 1),
        padding=[(padding, padding), (padding, padding)],
        dimension_numbers=("NCHW", "OIHW", "NCHW"))
    return out + bias.reshape(1, -1, 1, 1)


if __name__ == "__main__":
    # Small shapes consistent with the module (augodefunc's ConcatConv2d:
    # ksize=3, stride=1, padding=ksize//2=1; padding=0 is the bare default).
    dim_in, dim_out, ksize = 4, 8, 3
    N, H, W = 2, 16, 16

    key = jax.random.PRNGKey(0)
    kx, kw, kb = jax.random.split(key, 3)

    x = jax.random.normal(kx, (N, dim_in, H, W), jnp.float32)
    fan_in = (dim_in + 1) * ksize * ksize
    weight = jax.random.normal(kw, (dim_out, dim_in + 1, ksize, ksize),
                               jnp.float32) * (1.0 / fan_in) ** 0.5
    bias = jax.random.normal(kb, (dim_out,), jnp.float32) * 0.1
    t = jnp.float32(0.37)

    # 1) padding=1 — how Meta_AUGODE_TEM / augodefunc actually configures it.
    out_same = jax.block_until_ready(concat_conv2d(t, x, weight, bias, padding=1))
    ref_same = _reference(t, x, weight, bias, padding=1)
    assert out_same.shape == (N, dim_out, H, W)
    assert jnp.allclose(out_same, ref_same, rtol=1e-4, atol=1e-4), \
        "mismatch vs reference conv (padding=1)"

    # 2) padding=0 — ConcatConv2d default; exercises the t-into-bias fold.
    out_valid = jax.block_until_ready(concat_conv2d(t, x, weight, bias, padding=0))
    ref_valid = _reference(t, x, weight, bias, padding=0)
    assert out_valid.shape == (N, dim_out, H - ksize + 1, W - ksize + 1)
    assert jnp.allclose(out_valid, ref_valid, rtol=1e-4, atol=1e-4), \
        "mismatch vs reference conv (padding=0)"

    # 3) bf16-operand path (f32 MXU accumulation) — looser tolerance.
    out_bf16 = jax.block_until_ready(
        concat_conv2d(t, x, weight, bias, padding=1,
                      compute_dtype=jnp.bfloat16))
    assert jnp.allclose(out_bf16, ref_same, rtol=1e-1, atol=1e-1), \
        "mismatch vs reference conv (bf16 operands)"

    print("KERNEL_OK")
</pallas_src>

<mosaic_0001>
module attributes {stable_mosaic.version = 11 : i64} {
  func.func @_im2col_matmul_kernel(%arg0: i32, %arg1: memref<512x45xf32, #tpu.memory_space<vmem>>, %arg2: memref<45x8xf32, #tpu.memory_space<vmem>>, %arg3: memref<1x8xf32, #tpu.memory_space<vmem>>, %arg4: memref<512x8xf32, #tpu.memory_space<vmem>>) attributes {dimension_semantics = [#tpu.dimension_semantics<arbitrary>], iteration_bounds = array<i64: 1>, scalar_prefetch = 0 : i64, scratch_operands = 0 : i64, tpu.core_type = #tpu.core_type<tc>, window_params = [{transform_indices = @transform_0, window_bounds = array<i64: 512, 45>}, {pipeline_mode = #tpu.pipeline_mode<synchronous>, transform_indices = @transform_1, window_bounds = array<i64: 45, 8>}, {pipeline_mode = #tpu.pipeline_mode<synchronous>, transform_indices = @transform_2, window_bounds = array<i64: 1, 8>}, {transform_indices = @transform_3, window_bounds = array<i64: 512, 8>}]} {
    %c0 = arith.constant 0 : index
    %c0_0 = arith.constant 0 : index
    %0 = vector.load %arg1[%c0, %c0_0] : memref<512x45xf32, #tpu.memory_space<vmem>>, vector<512x45xf32>
    %c0_1 = arith.constant 0 : index
    %c0_2 = arith.constant 0 : index
    %1 = vector.load %arg2[%c0_1, %c0_2] : memref<45x8xf32, #tpu.memory_space<vmem>>, vector<45x8xf32>
    %cst = arith.constant dense<0.000000e+00> : vector<512x8xf32>
    %2 = tpu.matmul %0, %1, %cst {dimension_numbers = #tpu.dot_dimension_numbers<[1], [0], [0], [1], [0, 0, 1, 1], [], []>} : vector<512x45xf32>, vector<45x8xf32>, vector<512x8xf32> -> vector<512x8xf32>
    %c0_3 = arith.constant 0 : index
    %c0_4 = arith.constant 0 : index
    %3 = vector.load %arg3[%c0_3, %c0_4] : memref<1x8xf32, #tpu.memory_space<vmem>>, vector<1x8xf32>
    %4 = vector.broadcast %3 : vector<1x8xf32> to vector<512x8xf32>
    %5 = arith.addf %2, %4 : vector<512x8xf32>
    %c0_5 = arith.constant 0 : index
    %c0_6 = arith.constant 0 : index
    %6 = vector.load %arg4[%c0_5, %c0_6] : memref<512x8xf32, #tpu.memory_space<vmem>>, vector<512x8xf32>
    tpu.vector_store %arg4[%c0_5, %c0_6], %5 {strides = array<i32>} : memref<512x8xf32, #tpu.memory_space<vmem>>, vector<512x8xf32>,
    return
  }
  func.func @transform_0(%arg0: i32) -> (i32, i32) {
    %c0_i32 = arith.constant 0 : i32
    %c0_i32_0 = arith.constant 0 : i32
    return %arg0, %c0_i32 : i32, i32
  }
  func.func @transform_1(%arg0: i32) -> (i32, i32) {
    %c0_i32 = arith.constant 0 : i32
    %c0_i32_0 = arith.constant 0 : i32
    %c0_i32_1 = arith.constant 0 : i32
    return %c0_i32, %c0_i32_0 : i32, i32
  }
  func.func @transform_2(%arg0: i32) -> (i32, i32) {
    %c0_i32 = arith.constant 0 : i32
    %c0_i32_0 = arith.constant 0 : i32
    %c0_i32_1 = arith.constant 0 : i32
    return %c0_i32, %c0_i32_0 : i32, i32
  }
  func.func @transform_3(%arg0: i32) -> (i32, i32) {
    %c0_i32 = arith.constant 0 : i32
    %c0_i32_0 = arith.constant 0 : i32
    return %arg0, %c0_i32 : i32, i32
  }
}

</mosaic_0001>

<bundles_post_ra>
// kernel: tpu_custom_call.1
= control target key start
LH: loop header
LB: loop body
LE: loop exit
PB: predicated region body
PF: predicated region fallthrough
CT: control target
= control target key end

     0   :  { %vm284_vm0 = vcmask 1044480   ;;  %vm91_vm1 = vcmask 367616   ;;  %vm1007_vm2 = vmmov 1   ;;  %vm673_vm4 = vcmask 64512   ;;  %s1627_s1 = inlined_call_operand.vmem [shape: f32[45,8], index: 1, kind: input, shape index: {}]   ;;  %s1628_s0 = inlined_call_operand.vmem [shape: f32[512,45], index: 0, kind: input, shape index: {}]   ;;  %s1629_s2 = inlined_call_operand.vmem [shape: f32[1,8], index: 2, kind: input, shape index: {}]   ;;  %s1630_s3 = inlined_call_operand.vmem [shape: f32[512,8], index: 3, kind: output, shape index: {}]  }
   0x1   :  { %v78_v0 = vld [vmem:[%s1627_s1] sm:$0xff]  ;;  %v79_v1 = vld [vmem:[%s1627_s1 + $0x8] sm:$0xff]  ;;  %v80_v2 = vld [vmem:[%s1627_s1 + $0x10] sm:$0xff] }
   0x2   :  { %v986_v3 = vpack.c.bf16 %v79_v1, %v78_v0  ;;  %v81_v4 = vld [vmem:[%s1627_s1 + $0x18] sm:$0xff]  ;;  %v82_v6 = vld [vmem:[%s1627_s1 + $0x20] sm:$0xff]  ;;  %v83_v7 = vld [vmem:[%s1627_s1 + $0x28] sm:$0x1f] }
   0x3   :  { %v990_v5 = vpack.c.bf16 %v81_v4, %v80_v2  ;;  %v14_v8 = vld [vmem:[%s1628_s0] sm:$0xff]  ;;  %v994_v10 = vpack.c.bf16 %v83_v7, %v82_v6  ;;  %vm995_vm3 = vmpackc.low %vm284_vm0, %vm1007_vm2  ;;  %v15_v11 = vld [vmem:[%s1628_s0 + $0x8] sm:$0xff] }
   0x4   :  { %987 = vmatprep.subr.bf16.mxu0 %v986_v3  ;;  %1000 = vmatprep.subr.bf16.mxu1 %v986_v3  ;;  %v46_v9 = vld [vmem:[%s1628_s0 + $0x100] sm:$0xff]  ;;  %v47_v12 = vld [vmem:[%s1628_s0 + $0x108] sm:$0xff]  ;;  %v16_v13 = vld [vmem:[%s1628_s0 + $0x10] sm:$0xff] }
   0x5   :  { %989 = vmatpush3.bf16.msra.mxu0 %v986_v3  ;;  %1003 = vmatpush3.bf16.msra.mxu1 %v986_v3  ;;  %v48_v14 = vld [vmem:[%s1628_s0 + $0x110] sm:$0xff]  ;;  %v17_v15 = vld [vmem:[%s1628_s0 + $0x18] sm:$0xff]  ;;  %v18_v17 = vld [vmem:[%s1628_s0 + $0x20] sm:$0xff] }
   0x6   :  { %991 = vmatprep.subr.bf16.mxu0 %v990_v5  ;;  %1001 = vmatprep.subr.bf16.mxu1 %v990_v5  ;;  %v49_v16 = vld [vmem:[%s1628_s0 + $0x118] sm:$0xff]  ;;  %v50_v18 = vld [vmem:[%s1628_s0 + $0x120] sm:$0xff]  ;;  %v19_v19 = vld [vmem:[%s1628_s0 + $0x28] sm:$0xff] }
   0x7   :  { %890 = vmatprep.mubr.msk.f32.mxu0 %vm91_vm1, %v14_v8  ;;  %938 = vmatprep.mubr.msk.f32.mxu1 %vm91_vm1, %v46_v9  ;;  %v51_v20 = vld [vmem:[%s1628_s0 + $0x128] sm:$0xff]  ;;  %v20_v21 = vld [vmem:[%s1628_s0 + $0x30] sm:$0xff]  ;;  %v21_v23 = vld [vmem:[%s1628_s0 + $0x38] sm:$0xff] }
   0x8   :  { %v52_v22 = vld [vmem:[%s1628_s0 + $0x130] sm:$0xff]  ;;  %v53_v24 = vld [vmem:[%s1628_s0 + $0x138] sm:$0xff]  ;;  %v22_v25 = vld [vmem:[%s1628_s0 + $0x40] sm:$0xff] }
   0x9   :  { %993 = vmatpush3.bf16.msra.mxu0 %v990_v5  ;;  %1004 = vmatpush3.bf16.msra.mxu1 %v990_v5  ;;  %v54_v26 = vld [vmem:[%s1628_s0 + $0x140] sm:$0xff]  ;;  %v23_v27 = vld [vmem:[%s1628_s0 + $0x48] sm:$0xff]  ;;  %v24_v29 = vld [vmem:[%s1628_s0 + $0x50] sm:$0xff] }
   0xa   :  { %996 = vmatprep.subr.msk.bf16.mxu0 %vm995_vm3, %v994_v10  ;;  %1002 = vmatprep.subr.msk.bf16.mxu1 %vm995_vm3, %v994_v10  ;;  %v55_v28 = vld [vmem:[%s1628_s0 + $0x148] sm:$0xff]  ;;  %v56_v30 = vld [vmem:[%s1628_s0 + $0x150] sm:$0xff]  ;;  %v25_v31 = vld [vmem:[%s1628_s0 + $0x58] sm:$0xff] }
   0xb   :  { %v57_v32 = vld [vmem:[%s1628_s0 + $0x158] sm:$0xff]  ;;  %v26_v33 = vld [vmem:[%s1628_s0 + $0x60] sm:$0xff]  ;;  %v27_v35 = vld [vmem:[%s1628_s0 + $0x68] sm:$0xff] }
   0xc   :  { %v58_v34 = vld [vmem:[%s1628_s0 + $0x160] sm:$0xff]  ;;  %v59_v36 = vld [vmem:[%s1628_s0 + $0x168] sm:$0xff]  ;;  %v28_v37 = vld [vmem:[%s1628_s0 + $0x70] sm:$0xff] }
   0xd   :  { %999 = vmatpush3.bf16.msk.msra.mxu0 %vm995_vm3, %v994_v10  ;;  %1005 = vmatpush3.bf16.msk.msra.mxu1 %vm995_vm3, %v994_v10  ;;  %v60_v38 = vld [vmem:[%s1628_s0 + $0x170] sm:$0xff]  ;;  %v29_v39 = vld [vmem:[%s1628_s0 + $0x78] sm:$0xff]  ;;  %v30_v41 = vld [vmem:[%s1628_s0 + $0x80] sm:$0xff] }
   0xe   :  { %v61_v40 = vld [vmem:[%s1628_s0 + $0x178] sm:$0xff]  ;;  %v62_v42 = vld [vmem:[%s1628_s0 + $0x180] sm:$0xff]  ;;  %v31_v43 = vld [vmem:[%s1628_s0 + $0x88] sm:$0xff] }
   0xf   :  { %v63_v44 = vld [vmem:[%s1628_s0 + $0x188] sm:$0xff]  ;;  %v32_v45 = vld [vmem:[%s1628_s0 + $0x90] sm:$0xff]  ;;  %v33_v47 = vld [vmem:[%s1628_s0 + $0x98] sm:$0xff] }
  0x10   :  { %891 = vmatmul.mubr.msk.f32.vlgmr.msra.gmra.mrb[0].mxu0 %vm91_vm1, %v15_v11  ;;  %939 = vmatmul.mubr.msk.f32.vlgmr.msra.gmra.mrb[0].mxu1 %vm91_vm1, %v47_v12  ;;  %v64_v46 = vld [vmem:[%s1628_s0 + $0x190] sm:$0xff]  ;;  %v65_v48 = vld [vmem:[%s1628_s0 + $0x198] sm:$0xff]  ;;  %v34_v49 = vld [vmem:[%s1628_s0 + $0xa0] sm:$0xff] }
  0x11   :  { %893 = vmatprep.mubr.msk.f32.mxu0 %vm91_vm1, %v16_v13  ;;  %941 = vmatprep.mubr.msk.f32.mxu1 %vm91_vm1, %v48_v14  ;;  %v66_v50 = vld [vmem:[%s1628_s0 + $0x1a0] sm:$0xff]  ;;  %v35_v51 = vld [vmem:[%s1628_s0 + $0xa8] sm:$0xff]  ;;  %v36_v53 = vld [vmem:[%s1628_s0 + $0xb0] sm:$0xff] }
  0x12   :  { %v67_v52 = vld [vmem:[%s1628_s0 + $0x1a8] sm:$0xff]  ;;  %v68_v54 = vld [vmem:[%s1628_s0 + $0x1b0] sm:$0xff]  ;;  %v37_v55 = vld [vmem:[%s1628_s0 + $0xb8] sm:$0xff] }
  0x13   :  { %v69_v56 = vld [vmem:[%s1628_s0 + $0x1b8] sm:$0xff]  ;;  %v38_v57 = vld [vmem:[%s1628_s0 + $0xc0] sm:$0xff]  ;;  %v39_v59 = vld [vmem:[%s1628_s0 + $0xc8] sm:$0xff] }
  0x14   :  { %894 = vmatmul.mubr.msk.f32.gmra.mrb[2].mxu0 %vm91_vm1, %v17_v15  ;;  %942 = vmatmul.mubr.msk.f32.gmra.mrb[2].mxu1 %vm91_vm1, %v49_v16  ;;  %v70_v58 = vld [vmem:[%s1628_s0 + $0x1c0] sm:$0xff]  ;;  %v71_v60 = vld [vmem:[%s1628_s0 + $0x1c8] sm:$0xff]  ;;  %v40_v61 = vld [vmem:[%s1628_s0 + $0xd0] sm:$0xff] }
  0x15   :  { %896 = vmatprep.mubr.msk.f32.mxu0 %vm91_vm1, %v18_v17  ;;  %944 = vmatprep.mubr.msk.f32.mxu1 %vm91_vm1, %v50_v18  ;;  %v72_v62 = vld [vmem:[%s1628_s0 + $0x1d0] sm:$0xff]  ;;  %v41_v63 = vld [vmem:[%s1628_s0 + $0xd8] sm:$0xff]  ;;  %v42_v1 = vld [vmem:[%s1628_s0 + $0xe0] sm:$0xff] }
  0x16   :  { %v73_v0 = vld [vmem:[%s1628_s0 + $0x1d8] sm:$0xff]  ;;  %v74_v2 = vld [vmem:[%s1628_s0 + $0x1e0] sm:$0xff]  ;;  %v43_v3 = vld [vmem:[%s1628_s0 + $0xe8] sm:$0xff] }
  0x17   :  { %v75_v4 = vld [vmem:[%s1628_s0 + $0x1e8] sm:$0xff]  ;;  %v44_v5 = vld [vmem:[%s1628_s0 + $0xf0] sm:$0xff]  ;;  %v45_v7 = vld [vmem:[%s1628_s0 + $0xf8] sm:$0xff] }
  0x18   :  { %897 = vmatmul.mubr.msk.f32.gmra.mrb[4].mxu0 %vm91_vm1, %v19_v19  ;;  %945 = vmatmul.mubr.msk.f32.gmra.mrb[4].mxu1 %vm91_vm1, %v51_v20  ;;  %v76_v6 = vld [vmem:[%s1628_s0 + $0x1f0] sm:$0xff]  ;;  %v77_v8 = vld [vmem:[%s1628_s0 + $0x1f8] sm:$0xff]  ;;  %v1305_v9 = vld [vmem:[%s1629_s2] ss:$0 sm:$0xff] }
  0x19   :  { %899 = vmatprep.mubr.msk.f32.mxu0 %vm91_vm1, %v20_v21  ;;  %947 = vmatprep.mubr.msk.f32.mxu1 %vm91_vm1, %v52_v22 }
  0x1c   :  { %900 = vmatmul.mubr.msk.f32.gmra.mrb[6].mxu0 %vm91_vm1, %v21_v23  ;;  %948 = vmatmul.mubr.msk.f32.gmra.mrb[6].mxu1 %vm91_vm1, %v53_v24 }
  0x1d   :  { %902 = vmatprep.mubr.msk.f32.mxu0 %vm91_vm1, %v22_v25  ;;  %950 = vmatprep.mubr.msk.f32.mxu1 %vm91_vm1, %v54_v26 }
  0x20   :  { %903 = vmatmul.mubr.msk.f32.gmra.mrb[8].mxu0 %vm91_vm1, %v23_v27  ;;  %951 = vmatmul.mubr.msk.f32.gmra.mrb[8].mxu1 %vm91_vm1, %v55_v28 }
  0x21   :  { %905 = vmatprep.mubr.msk.f32.mxu0 %vm91_vm1, %v24_v29  ;;  %953 = vmatprep.mubr.msk.f32.mxu1 %vm91_vm1, %v56_v30 }
  0x24   :  { %906 = vmatmul.mubr.msk.f32.gmra.mrb[10].mxu0 %vm91_vm1, %v25_v31  ;;  %954 = vmatmul.mubr.msk.f32.gmra.mrb[10].mxu1 %vm91_vm1, %v57_v32 }
  0x25   :  { %908 = vmatprep.mubr.msk.f32.mxu0 %vm91_vm1, %v26_v33  ;;  %956 = vmatprep.mubr.msk.f32.mxu1 %vm91_vm1, %v58_v34 }
  0x28   :  { %909 = vmatmul.mubr.msk.f32.gmra.mrb[12].mxu0 %vm91_vm1, %v27_v35  ;;  %957 = vmatmul.mubr.msk.f32.gmra.mrb[12].mxu1 %vm91_vm1, %v59_v36 }
  0x29   :  { %911 = vmatprep.mubr.msk.f32.mxu0 %vm91_vm1, %v28_v37  ;;  %959 = vmatprep.mubr.msk.f32.mxu1 %vm91_vm1, %v60_v38 }
  0x2c   :  { %912 = vmatmul.mubr.msk.f32.gmra.mrb[14].mxu0 %vm91_vm1, %v29_v39  ;;  %960 = vmatmul.mubr.msk.f32.gmra.mrb[14].mxu1 %vm91_vm1, %v61_v40 }
  0x2d   :  { %914 = vmatprep.mubr.msk.f32.mxu0 %vm91_vm1, %v30_v41  ;;  %962 = vmatprep.mubr.msk.f32.mxu1 %vm91_vm1, %v62_v42 }
  0x30   :  { %915 = vmatmul.mubr.msk.f32.gmra.mrb[16].mxu0 %vm91_vm1, %v31_v43  ;;  %963 = vmatmul.mubr.msk.f32.gmra.mrb[16].mxu1 %vm91_vm1, %v63_v44 }
  0x31   :  { %917 = vmatprep.mubr.msk.f32.mxu0 %vm91_vm1, %v32_v45  ;;  %965 = vmatprep.mubr.msk.f32.mxu1 %vm91_vm1, %v64_v46 }
  0x34   :  { %918 = vmatmul.mubr.msk.f32.gmra.mrb[18].mxu0 %vm91_vm1, %v33_v47  ;;  %966 = vmatmul.mubr.msk.f32.gmra.mrb[18].mxu1 %vm91_vm1, %v65_v48 }
  0x35   :  { %920 = vmatprep.mubr.msk.f32.mxu0 %vm91_vm1, %v34_v49  ;;  %968 = vmatprep.mubr.msk.f32.mxu1 %vm91_vm1, %v66_v50 }
  0x38   :  { %921 = vmatmul.mubr.msk.f32.gmra.mrb[20].mxu0 %vm91_vm1, %v35_v51  ;;  %969 = vmatmul.mubr.msk.f32.gmra.mrb[20].mxu1 %vm91_vm1, %v67_v52 }
  0x39   :  { %923 = vmatprep.mubr.msk.f32.mxu0 %vm91_vm1, %v36_v53  ;;  %971 = vmatprep.mubr.msk.f32.mxu1 %vm91_vm1, %v68_v54 }
  0x3c   :  { %924 = vmatmul.mubr.msk.f32.gmra.mrb[22].mxu0 %vm91_vm1, %v37_v55  ;;  %972 = vmatmul.mubr.msk.f32.gmra.mrb[22].mxu1 %vm91_vm1, %v69_v56 }
  0x3d   :  { %926 = vmatprep.mubr.msk.f32.mxu0 %vm91_vm1, %v38_v57  ;;  %974 = vmatprep.mubr.msk.f32.mxu1 %vm91_vm1, %v70_v58 }
  0x40   :  { %927 = vmatmul.mubr.msk.f32.gmra.mrb[24].mxu0 %vm91_vm1, %v39_v59  ;;  %975 = vmatmul.mubr.msk.f32.gmra.mrb[24].mxu1 %vm91_vm1, %v71_v60 }
  0x41   :  { %929 = vmatprep.mubr.msk.f32.mxu0 %vm91_vm1, %v40_v61  ;;  %977 = vmatprep.mubr.msk.f32.mxu1 %vm91_vm1, %v72_v62 }
  0x44   :  { %930 = vmatmul.mubr.msk.f32.gmra.mrb[26].mxu0 %vm91_vm1, %v41_v63  ;;  %978 = vmatmul.mubr.msk.f32.gmra.mrb[26].mxu1 %vm91_vm1, %v73_v0 }
  0x45   :  { %932 = vmatprep.mubr.msk.f32.mxu0 %vm91_vm1, %v42_v1  ;;  %980 = vmatprep.mubr.msk.f32.mxu1 %vm91_vm1, %v74_v2 }
  0x48   :  { %933 = vmatmul.mubr.msk.f32.gmra.mrb[28].mxu0 %vm91_vm1, %v43_v3  ;;  %981 = vmatmul.mubr.msk.f32.gmra.mrb[28].mxu1 %vm91_vm1, %v75_v4 }
  0x49   :  { %935 = vmatprep.mubr.msk.f32.mxu0 %vm91_vm1, %v44_v5  ;;  %983 = vmatprep.mubr.msk.f32.mxu1 %vm91_vm1, %v76_v6 }
  0x4c   :  { %936 = vmatmul.mubr.msk.f32.gmra.mrb[30].mxu0 %vm91_vm1, %v45_v7  ;;  %984 = vmatmul.mubr.msk.f32.gmra.mrb[30].mxu1 %vm91_vm1, %v77_v8 }
  0xe3   :  { %v892_v10 = vpop.f32.mrb[0].mxu0  ;;  %v940_v11 = vpop.f32.mrb[0].mxu1 }
  0xe4   :  { %v360_v12 = vadd.f32 %v892_v10, %v1305_v9  ;;  %v520_v13 = vadd.f32 %v940_v11, %v1305_v9  ;;  %v354_v14 = vpop.f32.mrb[1].mxu0  ;;  %v514_v15 = vpop.f32.mrb[1].mxu1 }
  0xe5   :  { %v355_v16 = vadd.f32 %v1305_v9, %v354_v14  ;;  %v515_v17 = vadd.f32 %v1305_v9, %v514_v15 }
  0xe6   :  { %675 = vst.msk [vmem:[%s1630_s3 + $0x8] sm:$0xff] %vm673_vm4, %v360_v12  ;;  %707 = vst.msk [vmem:[%s1630_s3 + $0x108] sm:$0xff] %vm673_vm4, %v520_v13 }
  0xe7   :  { %674 = vst.msk [vmem:[%s1630_s3] sm:$0xff] %vm673_vm4, %v355_v16  ;;  %706 = vst.msk [vmem:[%s1630_s3 + $0x100] sm:$0xff] %vm673_vm4, %v515_v17  ;;  %v895_v18 = vpop.f32.mrb[2].mxu0  ;;  %v943_v19 = vpop.f32.mrb[2].mxu1 }
  0xe8   :  { %v370_v20 = vadd.f32 %v895_v18, %v1305_v9  ;;  %v530_v21 = vadd.f32 %v943_v19, %v1305_v9  ;;  %v364_v22 = vpop.f32.mrb[3].mxu0  ;;  %v524_v23 = vpop.f32.mrb[3].mxu1 }
  0xe9   :  { %v365_v24 = vadd.f32 %v1305_v9, %v364_v22  ;;  %v525_v25 = vadd.f32 %v1305_v9, %v524_v23 }
  0xea   :  { %677 = vst.msk [vmem:[%s1630_s3 + $0x18] sm:$0xff] %vm673_vm4, %v370_v20  ;;  %709 = vst.msk [vmem:[%s1630_s3 + $0x118] sm:$0xff] %vm673_vm4, %v530_v21 }
  0xeb   :  { %676 = vst.msk [vmem:[%s1630_s3 + $0x10] sm:$0xff] %vm673_vm4, %v365_v24  ;;  %708 = vst.msk [vmem:[%s1630_s3 + $0x110] sm:$0xff] %vm673_vm4, %v525_v25  ;;  %v898_v26 = vpop.f32.mrb[4].mxu0  ;;  %v946_v27 = vpop.f32.mrb[4].mxu1 }
  0xec   :  { %v380_v28 = vadd.f32 %v898_v26, %v1305_v9  ;;  %v540_v29 = vadd.f32 %v946_v27, %v1305_v9  ;;  %v374_v30 = vpop.f32.mrb[5].mxu0  ;;  %v534_v31 = vpop.f32.mrb[5].mxu1 }
  0xed   :  { %v375_v32 = vadd.f32 %v1305_v9, %v374_v30  ;;  %v535_v33 = vadd.f32 %v1305_v9, %v534_v31 }
  0xee   :  { %679 = vst.msk [vmem:[%s1630_s3 + $0x28] sm:$0xff] %vm673_vm4, %v380_v28  ;;  %711 = vst.msk [vmem:[%s1630_s3 + $0x128] sm:$0xff] %vm673_vm4, %v540_v29 }
  0xef   :  { %678 = vst.msk [vmem:[%s1630_s3 + $0x20] sm:$0xff] %vm673_vm4, %v375_v32  ;;  %710 = vst.msk [vmem:[%s1630_s3 + $0x120] sm:$0xff] %vm673_vm4, %v535_v33  ;;  %v901_v34 = vpop.f32.mrb[6].mxu0  ;;  %v949_v35 = vpop.f32.mrb[6].mxu1 }
  0xf0   :  { %v390_v36 = vadd.f32 %v901_v34, %v1305_v9  ;;  %v550_v37 = vadd.f32 %v949_v35, %v1305_v9  ;;  %v384_v38 = vpop.f32.mrb[7].mxu0  ;;  %v544_v39 = vpop.f32.mrb[7].mxu1 }
  0xf1   :  { %v385_v40 = vadd.f32 %v1305_v9, %v384_v38  ;;  %v545_v41 = vadd.f32 %v1305_v9, %v544_v39 }
  0xf2   :  { %681 = vst.msk [vmem:[%s1630_s3 + $0x38] sm:$0xff] %vm673_vm4, %v390_v36  ;;  %713 = vst.msk [vmem:[%s1630_s3 + $0x138] sm:$0xff] %vm673_vm4, %v550_v37 }
  0xf3   :  { %680 = vst.msk [vmem:[%s1630_s3 + $0x30] sm:$0xff] %vm673_vm4, %v385_v40  ;;  %712 = vst.msk [vmem:[%s1630_s3 + $0x130] sm:$0xff] %vm673_vm4, %v545_v41  ;;  %v904_v42 = vpop.f32.mrb[8].mxu0  ;;  %v952_v43 = vpop.f32.mrb[8].mxu1 }
  0xf4   :  { %v400_v44 = vadd.f32 %v904_v42, %v1305_v9  ;;  %v560_v45 = vadd.f32 %v952_v43, %v1305_v9  ;;  %v394_v46 = vpop.f32.mrb[9].mxu0  ;;  %v554_v47 = vpop.f32.mrb[9].mxu1 }
  0xf5   :  { %v395_v48 = vadd.f32 %v1305_v9, %v394_v46  ;;  %v555_v49 = vadd.f32 %v1305_v9, %v554_v47 }
  0xf6   :  { %683 = vst.msk [vmem:[%s1630_s3 + $0x48] sm:$0xff] %vm673_vm4, %v400_v44  ;;  %715 = vst.msk [vmem:[%s1630_s3 + $0x148] sm:$0xff] %vm673_vm4, %v560_v45 }
  0xf7   :  { %682 = vst.msk [vmem:[%s1630_s3 + $0x40] sm:$0xff] %vm673_vm4, %v395_v48  ;;  %714 = vst.msk [vmem:[%s1630_s3 + $0x140] sm:$0xff] %vm673_vm4, %v555_v49  ;;  %v907_v50 = vpop.f32.mrb[10].mxu0  ;;  %v955_v51 = vpop.f32.mrb[10].mxu1 }
  0xf8   :  { %v410_v52 = vadd.f32 %v907_v50, %v1305_v9  ;;  %v570_v53 = vadd.f32 %v955_v51, %v1305_v9  ;;  %v404_v54 = vpop.f32.mrb[11].mxu0  ;;  %v564_v55 = vpop.f32.mrb[11].mxu1 }
  0xf9   :  { %v405_v56 = vadd.f32 %v1305_v9, %v404_v54  ;;  %v565_v57 = vadd.f32 %v1305_v9, %v564_v55 }
  0xfa   :  { %685 = vst.msk [vmem:[%s1630_s3 + $0x58] sm:$0xff] %vm673_vm4, %v410_v52  ;;  %717 = vst.msk [vmem:[%s1630_s3 + $0x158] sm:$0xff] %vm673_vm4, %v570_v53 }
  0xfb   :  { %684 = vst.msk [vmem:[%s1630_s3 + $0x50] sm:$0xff] %vm673_vm4, %v405_v56  ;;  %716 = vst.msk [vmem:[%s1630_s3 + $0x150] sm:$0xff] %vm673_vm4, %v565_v57  ;;  %v910_v58 = vpop.f32.mrb[12].mxu0  ;;  %v958_v59 = vpop.f32.mrb[12].mxu1 }
  0xfc   :  { %v420_v60 = vadd.f32 %v910_v58, %v1305_v9  ;;  %v580_v61 = vadd.f32 %v958_v59, %v1305_v9  ;;  %v414_v62 = vpop.f32.mrb[13].mxu0  ;;  %v574_v63 = vpop.f32.mrb[13].mxu1 }
  0xfd   :  { %v415_v0 = vadd.f32 %v1305_v9, %v414_v62  ;;  %v575_v1 = vadd.f32 %v1305_v9, %v574_v63 }
  0xfe   :  { %687 = vst.msk [vmem:[%s1630_s3 + $0x68] sm:$0xff] %vm673_vm4, %v420_v60  ;;  %719 = vst.msk [vmem:[%s1630_s3 + $0x168] sm:$0xff] %vm673_vm4, %v580_v61 }
  0xff   :  { %686 = vst.msk [vmem:[%s1630_s3 + $0x60] sm:$0xff] %vm673_vm4, %v415_v0  ;;  %718 = vst.msk [vmem:[%s1630_s3 + $0x160] sm:$0xff] %vm673_vm4, %v575_v1  ;;  %v913_v2 = vpop.f32.mrb[14].mxu0  ;;  %v961_v3 = vpop.f32.mrb[14].mxu1 }
 0x100   :  { %v430_v4 = vadd.f32 %v913_v2, %v1305_v9  ;;  %v590_v5 = vadd.f32 %v961_v3, %v1305_v9  ;;  %v424_v6 = vpop.f32.mrb[15].mxu0  ;;  %v584_v7 = vpop.f32.mrb[15].mxu1 }
 0x101   :  { %v425_v8 = vadd.f32 %v1305_v9, %v424_v6  ;;  %v585_v10 = vadd.f32 %v1305_v9, %v584_v7 }
 0x102   :  { %689 = vst.msk [vmem:[%s1630_s3 + $0x78] sm:$0xff] %vm673_vm4, %v430_v4  ;;  %721 = vst.msk [vmem:[%s1630_s3 + $0x178] sm:$0xff] %vm673_vm4, %v590_v5 }
 0x103   :  { %688 = vst.msk [vmem:[%s1630_s3 + $0x70] sm:$0xff] %vm673_vm4, %v425_v8  ;;  %720 = vst.msk [vmem:[%s1630_s3 + $0x170] sm:$0xff] %vm673_vm4, %v585_v10  ;;  %v916_v11 = vpop.f32.mrb[16].mxu0  ;;  %v964_v12 = vpop.f32.mrb[16].mxu1 }
 0x104   :  { %v440_v13 = vadd.f32 %v916_v11, %v1305_v9  ;;  %v600_v14 = vadd.f32 %v964_v12, %v1305_v9  ;;  %v434_v15 = vpop.f32.mrb[17].mxu0  ;;  %v594_v16 = vpop.f32.mrb[17].mxu1 }
 0x105   :  { %v435_v17 = vadd.f32 %v1305_v9, %v434_v15  ;;  %v595_v18 = vadd.f32 %v1305_v9, %v594_v16 }
 0x106   :  { %691 = vst.msk [vmem:[%s1630_s3 + $0x88] sm:$0xff] %vm673_vm4, %v440_v13  ;;  %723 = vst.msk [vmem:[%s1630_s3 + $0x188] sm:$0xff] %vm673_vm4, %v600_v14 }
 0x107   :  { %690 = vst.msk [vmem:[%s1630_s3 + $0x80] sm:$0xff] %vm673_vm4, %v435_v17  ;;  %722 = vst.msk [vmem:[%s1630_s3 + $0x180] sm:$0xff] %vm673_vm4, %v595_v18  ;;  %v919_v19 = vpop.f32.mrb[18].mxu0  ;;  %v967_v20 = vpop.f32.mrb[18].mxu1 }
 0x108   :  { %v450_v21 = vadd.f32 %v919_v19, %v1305_v9  ;;  %v610_v22 = vadd.f32 %v967_v20, %v1305_v9  ;;  %v444_v23 = vpop.f32.mrb[19].mxu0  ;;  %v604_v24 = vpop.f32.mrb[19].mxu1 }
 0x109   :  { %v445_v25 = vadd.f32 %v1305_v9, %v444_v23  ;;  %v605_v26 = vadd.f32 %v1305_v9, %v604_v24 }
 0x10a   :  { %693 = vst.msk [vmem:[%s1630_s3 + $0x98] sm:$0xff] %vm673_vm4, %v450_v21  ;;  %725 = vst.msk [vmem:[%s1630_s3 + $0x198] sm:$0xff] %vm673_vm4, %v610_v22 }
 0x10b   :  { %692 = vst.msk [vmem:[%s1630_s3 + $0x90] sm:$0xff] %vm673_vm4, %v445_v25  ;;  %724 = vst.msk [vmem:[%s1630_s3 + $0x190] sm:$0xff] %vm673_vm4, %v605_v26  ;;  %v922_v27 = vpop.f32.mrb[20].mxu0  ;;  %v970_v28 = vpop.f32.mrb[20].mxu1 }
 0x10c   :  { %v460_v29 = vadd.f32 %v922_v27, %v1305_v9  ;;  %v620_v30 = vadd.f32 %v970_v28, %v1305_v9  ;;  %v454_v31 = vpop.f32.mrb[21].mxu0  ;;  %v614_v32 = vpop.f32.mrb[21].mxu1 }
 0x10d   :  { %v455_v33 = vadd.f32 %v1305_v9, %v454_v31  ;;  %v615_v34 = vadd.f32 %v1305_v9, %v614_v32 }
 0x10e   :  { %695 = vst.msk [vmem:[%s1630_s3 + $0xa8] sm:$0xff] %vm673_vm4, %v460_v29  ;;  %727 = vst.msk [vmem:[%s1630_s3 + $0x1a8] sm:$0xff] %vm673_vm4, %v620_v30 }
 0x10f   :  { %694 = vst.msk [vmem:[%s1630_s3 + $0xa0] sm:$0xff] %vm673_vm4, %v455_v33  ;;  %726 = vst.msk [vmem:[%s1630_s3 + $0x1a0] sm:$0xff] %vm673_vm4, %v615_v34  ;;  %v925_v35 = vpop.f32.mrb[22].mxu0  ;;  %v973_v36 = vpop.f32.mrb[22].mxu1 }
 0x110   :  { %v470_v37 = vadd.f32 %v925_v35, %v1305_v9  ;;  %v630_v38 = vadd.f32 %v973_v36, %v1305_v9  ;;  %v464_v39 = vpop.f32.mrb[23].mxu0  ;;  %v624_v40 = vpop.f32.mrb[23].mxu1 }
 0x111   :  { %v465_v41 = vadd.f32 %v1305_v9, %v464_v39  ;;  %v625_v42 = vadd.f32 %v1305_v9, %v624_v40 }
 0x112   :  { %697 = vst.msk [vmem:[%s1630_s3 + $0xb8] sm:$0xff] %vm673_vm4, %v470_v37  ;;  %729 = vst.msk [vmem:[%s1630_s3 + $0x1b8] sm:$0xff] %vm673_vm4, %v630_v38 }
 0x113   :  { %696 = vst.msk [vmem:[%s1630_s3 + $0xb0] sm:$0xff] %vm673_vm4, %v465_v41  ;;  %728 = vst.msk [vmem:[%s1630_s3 + $0x1b0] sm:$0xff] %vm673_vm4, %v625_v42  ;;  %v928_v43 = vpop.f32.mrb[24].mxu0  ;;  %v976_v44 = vpop.f32.mrb[24].mxu1 }
 0x114   :  { %v480_v45 = vadd.f32 %v928_v43, %v1305_v9  ;;  %v640_v46 = vadd.f32 %v976_v44, %v1305_v9  ;;  %v474_v47 = vpop.f32.mrb[25].mxu0  ;;  %v634_v48 = vpop.f32.mrb[25].mxu1 }
 0x115   :  { %v475_v49 = vadd.f32 %v1305_v9, %v474_v47  ;;  %v635_v50 = vadd.f32 %v1305_v9, %v634_v48 }
 0x116   :  { %699 = vst.msk [vmem:[%s1630_s3 + $0xc8] sm:$0xff] %vm673_vm4, %v480_v45  ;;  %731 = vst.msk [vmem:[%s1630_s3 + $0x1c8] sm:$0xff] %vm673_vm4, %v640_v46 }
 0x117   :  { %698 = vst.msk [vmem:[%s1630_s3 + $0xc0] sm:$0xff] %vm673_vm4, %v475_v49  ;;  %730 = vst.msk [vmem:[%s1630_s3 + $0x1c0] sm:$0xff] %vm673_vm4, %v635_v50  ;;  %v931_v51 = vpop.f32.mrb[26].mxu0  ;;  %v979_v52 = vpop.f32.mrb[26].mxu1 }
 0x118   :  { %v490_v53 = vadd.f32 %v931_v51, %v1305_v9  ;;  %v650_v54 = vadd.f32 %v979_v52, %v1305_v9  ;;  %v484_v55 = vpop.f32.mrb[27].mxu0  ;;  %v644_v56 = vpop.f32.mrb[27].mxu1 }
 0x119   :  { %v485_v57 = vadd.f32 %v1305_v9, %v484_v55  ;;  %v645_v58 = vadd.f32 %v1305_v9, %v644_v56 }
 0x11a   :  { %701 = vst.msk [vmem:[%s1630_s3 + $0xd8] sm:$0xff] %vm673_vm4, %v490_v53  ;;  %733 = vst.msk [vmem:[%s1630_s3 + $0x1d8] sm:$0xff] %vm673_vm4, %v650_v54 }
 0x11b   :  { %700 = vst.msk [vmem:[%s1630_s3 + $0xd0] sm:$0xff] %vm673_vm4, %v485_v57  ;;  %732 = vst.msk [vmem:[%s1630_s3 + $0x1d0] sm:$0xff] %vm673_vm4, %v645_v58  ;;  %v934_v59 = vpop.f32.mrb[28].mxu0  ;;  %v982_v60 = vpop.f32.mrb[28].mxu1 }
 0x11c   :  { %v500_v61 = vadd.f32 %v934_v59, %v1305_v9  ;;  %v660_v62 = vadd.f32 %v982_v60, %v1305_v9  ;;  %v494_v63 = vpop.f32.mrb[29].mxu0  ;;  %v654_v0 = vpop.f32.mrb[29].mxu1 }
 0x11d   :  { %v495_v1 = vadd.f32 %v1305_v9, %v494_v63  ;;  %v655_v2 = vadd.f32 %v1305_v9, %v654_v0 }
 0x11e   :  { %703 = vst.msk [vmem:[%s1630_s3 + $0xe8] sm:$0xff] %vm673_vm4, %v500_v61  ;;  %735 = vst.msk [vmem:[%s1630_s3 + $0x1e8] sm:$0xff] %vm673_vm4, %v660_v62 }
 0x11f   :  { %702 = vst.msk [vmem:[%s1630_s3 + $0xe0] sm:$0xff] %vm673_vm4, %v495_v1  ;;  %734 = vst.msk [vmem:[%s1630_s3 + $0x1e0] sm:$0xff] %vm673_vm4, %v655_v2  ;;  %v937_v3 = vpop.f32.mrb[30].mxu0  ;;  %v985_v4 = vpop.f32.mrb[30].mxu1 }
 0x120   :  { %v510_v5 = vadd.f32 %v937_v3, %v1305_v9  ;;  %v670_v6 = vadd.f32 %v985_v4, %v1305_v9  ;;  %v504_v7 = vpop.f32.mrb[31].mxu0  ;;  %v664_v8 = vpop.f32.mrb[31].mxu1 }
 0x121   :  { %v505_v10 = vadd.f32 %v1305_v9, %v504_v7  ;;  %v665_v11 = vadd.f32 %v1305_v9, %v664_v8 }
 0x122   :  { %705 = vst.msk [vmem:[%s1630_s3 + $0xf8] sm:$0xff] %vm673_vm4, %v510_v5  ;;  %737 = vst.msk [vmem:[%s1630_s3 + $0x1f8] sm:$0xff] %vm673_vm4, %v670_v6 }
 0x123   :  { %704 = vst.msk [vmem:[%s1630_s3 + $0xf0] sm:$0xff] %vm673_vm4, %v505_v10  ;;  %736 = vst.msk [vmem:[%s1630_s3 + $0x1f0] sm:$0xff] %vm673_vm4, %v665_v11 }

</bundles_post_ra>
